<compile_context>
chip_gen: v5e
topology: v5e:2x2
jax: 0.10.0
libtpu: 0.0.40
codegen_flags: <defaults>
</compile_context>

<pallas_src>
import jax
import jax.numpy as jnp
from jax.experimental import pallas as pl
from jax.experimental.pallas import tpu as pltpu

LANE = 128          # hidden feature dims padded to lane width for MXU tiles
IN_PAD = 16         # input lanes kept narrow (9 -> 16) to minimize input DMA
OUT_PAD = 16        # output lanes kept narrow (10 -> 16) to minimize writeback
N_CLASSES = 10      # real output classes (fc4 out_features)
IN_FEATURES = 9     # real input features


def mlp_kernel(x_ref,
               w1_ref, b1_ref,
               w2_ref, b2_ref,
               w3_ref, b3_ref,
               w4_ref, b4_ref,
               o_ref):
    x = x_ref[...]  # (tb, 16) f32, lanes >= 9 are zero

    # fc1 + relu   (zero-padded lanes stay exactly zero through relu)
    h = jnp.dot(x, w1_ref[...], preferred_element_type=jnp.float32) + b1_ref[...]
    h = jnp.maximum(h, 0.0)
    # fc2 + relu
    h = jnp.dot(h, w2_ref[...], preferred_element_type=jnp.float32) + b2_ref[...]
    h = jnp.maximum(h, 0.0)
    # fc3 + relu
    h = jnp.dot(h, w3_ref[...], preferred_element_type=jnp.float32) + b3_ref[...]
    h = jnp.maximum(h, 0.0)
    # fc4 (no activation) -> (tb, 16)
    logits = jnp.dot(h, w4_ref[...], preferred_element_type=jnp.float32) + b4_ref[...]

    # log_softmax over the 10 real classes only (padded lanes masked out)
    lane = jax.lax.broadcasted_iota(jnp.int32, logits.shape, dimension=1)
    valid = lane < N_CLASSES
    logits = jnp.where(valid, logits, jnp.float32(-1e30))

    m = jnp.max(logits, axis=-1, keepdims=True)
    shifted = logits - m
    ex = jnp.where(valid, jnp.exp(shifted), 0.0)
    lse = jnp.log(jnp.sum(ex, axis=-1, keepdims=True))
    # Lanes 10..15 of the output hold ~-1e30 garbage; wrapper slices [:, :10].
    o_ref[...] = (shifted - lse).astype(o_ref.dtype)


def _pad2d(a, rows, cols):
    r, c = a.shape
    return jnp.pad(a, ((0, rows - r), (0, cols - c)))


def pad_params(params):
    """Zero-pad parameters once, up front, to their kernel-resident shapes."""
    p = {}
    p["w1"] = _pad2d(params["w1"].astype(jnp.float32), IN_PAD, LANE)   # (16, 128)
    p["b1"] = _pad2d(params["b1"].astype(jnp.float32), 1, LANE)        # (1, 128)
    p["w2"] = _pad2d(params["w2"].astype(jnp.float32), LANE, LANE)     # (128, 128)
    p["b2"] = _pad2d(params["b2"].astype(jnp.float32), 1, LANE)
    p["w3"] = _pad2d(params["w3"].astype(jnp.float32), LANE, LANE)     # (128, 128)
    p["b3"] = _pad2d(params["b3"].astype(jnp.float32), 1, LANE)
    p["w4"] = _pad2d(params["w4"].astype(jnp.float32), LANE, OUT_PAD)  # (128, 16)
    p["b4"] = _pad2d(params["b4"].astype(jnp.float32), 1, OUT_PAD)     # (1, 16)
    return p
    # TODO(synk): optionally coalesce the 4 weight/bias streams into 2 arrays
    # to cut DMA-descriptor bookkeeping; left separate for clarity (small win).


def net_forward(x, padded_params, *, block_rows=2048):
    """x: (B, 9) float32. padded_params: output of pad_params()."""
    B = x.shape[0]

    # Row tile: multiple of 8; chosen so the batch grid has >= 2 steps whenever
    # B > 8 (v7x megacore split), capped at block_rows (2048 keeps the working
    # set a few MiB, inside every generation's default scoped-VMEM limit).
    half = -(-B // 2)                                   # cdiv(B, 2)
    tb = max(8, min(block_rows, ((half + 7) // 8) * 8))
    b_pad = ((B + tb - 1) // tb) * tb

    # Narrow padding only: rows to tile multiple, lanes 9 -> 16.
    x_p = jnp.pad(x.astype(jnp.float32),
                  ((0, b_pad - B), (0, IN_PAD - x.shape[1])))

    grid = (b_pad // tb,)
    x_spec = pl.BlockSpec((tb, IN_PAD), lambda i: (i, 0))     # narrow input DMA
    out_spec = pl.BlockSpec((tb, OUT_PAD), lambda i: (i, 0))  # narrow output DMA

    def resident(shape):                                      # weights/biases: DMA once
        return pl.BlockSpec(shape, lambda i: (0, 0))

    out = pl.pallas_call(
        mlp_kernel,
        out_shape=jax.ShapeDtypeStruct((b_pad, OUT_PAD), jnp.float32),
        grid=grid,
        in_specs=[x_spec,
                  resident((IN_PAD, LANE)), resident((1, LANE)),
                  resident((LANE, LANE)), resident((1, LANE)),
                  resident((LANE, LANE)), resident((1, LANE)),
                  resident((LANE, OUT_PAD)), resident((1, OUT_PAD))],
        out_specs=out_spec,
        compiler_params=pltpu.CompilerParams(
            dimension_semantics=("parallel",)),
    )(x_p,
      padded_params["w1"], padded_params["b1"],
      padded_params["w2"], padded_params["b2"],
      padded_params["w3"], padded_params["b3"],
      padded_params["w4"], padded_params["b4"])

    return out[:B, :N_CLASSES]


def init_params(key):
    """Deterministic synthetic params; PyTorch-style uniform(-1/sqrt(fan_in), +)."""
    dims = [(9, 9), (9, 20), (20, 50), (50, 10)]
    params = {}
    keys = jax.random.split(key, 2 * len(dims))
    for i, (fan_in, fan_out) in enumerate(dims):
        bound = 1.0 / jnp.sqrt(jnp.float32(fan_in))
        w = jax.random.uniform(keys[2 * i], (fan_in, fan_out),
                               minval=-bound, maxval=bound, dtype=jnp.float32)
        b = jax.random.uniform(keys[2 * i + 1], (1, fan_out),
                               minval=-bound, maxval=bound, dtype=jnp.float32)
        params[f"w{i + 1}"] = w
        params[f"b{i + 1}"] = b
    return params


def reference_forward(x, params):
    h = x
    for i in range(1, 4):
        h = jnp.maximum(h @ params[f"w{i}"] + params[f"b{i}"], 0.0)
    logits = h @ params["w4"] + params["b4"]
    return jax.nn.log_softmax(logits, axis=-1)


if __name__ == "__main__":
    key = jax.random.PRNGKey(0)
    pkey, xkey, xkey2 = jax.random.split(key, 3)
    params = init_params(pkey)
    padded_params = pad_params(params)

    # small-shape sanity run (per spec)
    batch = 8
    x = jax.random.normal(xkey, (batch, IN_FEATURES), dtype=jnp.float32)
    out = net_forward(x, padded_params)
    jax.block_until_ready(out)

    ref = reference_forward(x, params)
    assert out.shape == (batch, N_CLASSES)
    assert bool(jnp.all(jnp.abs(out - ref) < 1e-4))
    row_sums = jnp.sum(jnp.exp(out), axis=1)
    assert bool(jnp.all(jnp.abs(row_sums - 1.0) < 1e-4))

    # uneven larger batch exercises the multi-step batch grid + padding path
    batch2 = 300
    x2 = jax.random.normal(xkey2, (batch2, IN_FEATURES), dtype=jnp.float32)
    out2 = net_forward(x2, padded_params)
    jax.block_until_ready(out2)
    ref2 = reference_forward(x2, params)
    assert out2.shape == (batch2, N_CLASSES)
    assert bool(jnp.all(jnp.abs(out2 - ref2) < 1e-4))
    row_sums2 = jnp.sum(jnp.exp(out2), axis=1)
    assert bool(jnp.all(jnp.abs(row_sums2 - 1.0) < 1e-4))

    print("KERNEL_OK")
</pallas_src>

<mosaic_0001>
module attributes {stable_mosaic.version = 11 : i64} {
  func.func @mlp_kernel(%arg0: i32, %arg1: memref<8x16xf32, #tpu.memory_space<vmem>>, %arg2: memref<16x128xf32, #tpu.memory_space<vmem>>, %arg3: memref<1x128xf32, #tpu.memory_space<vmem>>, %arg4: memref<128x128xf32, #tpu.memory_space<vmem>>, %arg5: memref<1x128xf32, #tpu.memory_space<vmem>>, %arg6: memref<128x128xf32, #tpu.memory_space<vmem>>, %arg7: memref<1x128xf32, #tpu.memory_space<vmem>>, %arg8: memref<128x16xf32, #tpu.memory_space<vmem>>, %arg9: memref<1x16xf32, #tpu.memory_space<vmem>>, %arg10: memref<8x16xf32, #tpu.memory_space<vmem>>) attributes {dimension_semantics = [#tpu.dimension_semantics<parallel>], iteration_bounds = array<i64: 1>, scalar_prefetch = 0 : i64, scratch_operands = 0 : i64, tpu.core_type = #tpu.core_type<tc>, window_params = [{transform_indices = @transform_0, window_bounds = array<i64: 8, 16>}, {pipeline_mode = #tpu.pipeline_mode<synchronous>, transform_indices = @transform_1, window_bounds = array<i64: 16, 128>}, {pipeline_mode = #tpu.pipeline_mode<synchronous>, transform_indices = @transform_2, window_bounds = array<i64: 1, 128>}, {pipeline_mode = #tpu.pipeline_mode<synchronous>, transform_indices = @transform_3, window_bounds = array<i64: 128, 128>}, {pipeline_mode = #tpu.pipeline_mode<synchronous>, transform_indices = @transform_4, window_bounds = array<i64: 1, 128>}, {pipeline_mode = #tpu.pipeline_mode<synchronous>, transform_indices = @transform_5, window_bounds = array<i64: 128, 128>}, {pipeline_mode = #tpu.pipeline_mode<synchronous>, transform_indices = @transform_6, window_bounds = array<i64: 1, 128>}, {pipeline_mode = #tpu.pipeline_mode<synchronous>, transform_indices = @transform_7, window_bounds = array<i64: 128, 16>}, {pipeline_mode = #tpu.pipeline_mode<synchronous>, transform_indices = @transform_8, window_bounds = array<i64: 1, 16>}, {transform_indices = @transform_9, window_bounds = array<i64: 8, 16>}]} {
    %c0 = arith.constant 0 : index
    %c0_0 = arith.constant 0 : index
    %0 = vector.load %arg1[%c0, %c0_0] : memref<8x16xf32, #tpu.memory_space<vmem>>, vector<8x16xf32>
    %c0_1 = arith.constant 0 : index
    %c0_2 = arith.constant 0 : index
    %1 = vector.load %arg2[%c0_1, %c0_2] : memref<16x128xf32, #tpu.memory_space<vmem>>, vector<16x128xf32>
    %cst = arith.constant dense<0.000000e+00> : vector<8x128xf32>
    %2 = tpu.matmul %0, %1, %cst {dimension_numbers = #tpu.dot_dimension_numbers<[1], [0], [0], [1], [0, 0, 1, 1], [], []>} : vector<8x16xf32>, vector<16x128xf32>, vector<8x128xf32> -> vector<8x128xf32>
    %c0_3 = arith.constant 0 : index
    %c0_4 = arith.constant 0 : index
    %3 = vector.load %arg3[%c0_3, %c0_4] : memref<1x128xf32, #tpu.memory_space<vmem>>, vector<1x128xf32>
    %4 = vector.broadcast %3 : vector<1x128xf32> to vector<8x128xf32>
    %5 = arith.addf %2, %4 : vector<8x128xf32>
    %cst_5 = arith.constant 0.000000e+00 : f32
    %6 = vector.broadcast %cst_5 : f32 to vector<8x128xf32>
    %7 = arith.maximumf %5, %6 : vector<8x128xf32>
    %c0_6 = arith.constant 0 : index
    %c0_7 = arith.constant 0 : index
    %8 = vector.load %arg4[%c0_6, %c0_7] : memref<128x128xf32, #tpu.memory_space<vmem>>, vector<128x128xf32>
    %cst_8 = arith.constant dense<0.000000e+00> : vector<8x128xf32>
    %9 = tpu.matmul %7, %8, %cst_8 {dimension_numbers = #tpu.dot_dimension_numbers<[1], [0], [0], [1], [0, 0, 1, 1], [], []>} : vector<8x128xf32>, vector<128x128xf32>, vector<8x128xf32> -> vector<8x128xf32>
    %c0_9 = arith.constant 0 : index
    %c0_10 = arith.constant 0 : index
    %10 = vector.load %arg5[%c0_9, %c0_10] : memref<1x128xf32, #tpu.memory_space<vmem>>, vector<1x128xf32>
    %11 = vector.broadcast %10 : vector<1x128xf32> to vector<8x128xf32>
    %12 = arith.addf %9, %11 : vector<8x128xf32>
    %cst_11 = arith.constant 0.000000e+00 : f32
    %13 = vector.broadcast %cst_11 : f32 to vector<8x128xf32>
    %14 = arith.maximumf %12, %13 : vector<8x128xf32>
    %c0_12 = arith.constant 0 : index
    %c0_13 = arith.constant 0 : index
    %15 = vector.load %arg6[%c0_12, %c0_13] : memref<128x128xf32, #tpu.memory_space<vmem>>, vector<128x128xf32>
    %cst_14 = arith.constant dense<0.000000e+00> : vector<8x128xf32>
    %16 = tpu.matmul %14, %15, %cst_14 {dimension_numbers = #tpu.dot_dimension_numbers<[1], [0], [0], [1], [0, 0, 1, 1], [], []>} : vector<8x128xf32>, vector<128x128xf32>, vector<8x128xf32> -> vector<8x128xf32>
    %c0_15 = arith.constant 0 : index
    %c0_16 = arith.constant 0 : index
    %17 = vector.load %arg7[%c0_15, %c0_16] : memref<1x128xf32, #tpu.memory_space<vmem>>, vector<1x128xf32>
    %18 = vector.broadcast %17 : vector<1x128xf32> to vector<8x128xf32>
    %19 = arith.addf %16, %18 : vector<8x128xf32>
    %cst_17 = arith.constant 0.000000e+00 : f32
    %20 = vector.broadcast %cst_17 : f32 to vector<8x128xf32>
    %21 = arith.maximumf %19, %20 : vector<8x128xf32>
    %c0_18 = arith.constant 0 : index
    %c0_19 = arith.constant 0 : index
    %22 = vector.load %arg8[%c0_18, %c0_19] : memref<128x16xf32, #tpu.memory_space<vmem>>, vector<128x16xf32>
    %cst_20 = arith.constant dense<0.000000e+00> : vector<8x16xf32>
    %23 = tpu.matmul %21, %22, %cst_20 {dimension_numbers = #tpu.dot_dimension_numbers<[1], [0], [0], [1], [0, 0, 1, 1], [], []>} : vector<8x128xf32>, vector<128x16xf32>, vector<8x16xf32> -> vector<8x16xf32>
    %c0_21 = arith.constant 0 : index
    %c0_22 = arith.constant 0 : index
    %24 = vector.load %arg9[%c0_21, %c0_22] : memref<1x16xf32, #tpu.memory_space<vmem>>, vector<1x16xf32>
    %25 = vector.broadcast %24 : vector<1x16xf32> to vector<8x16xf32>
    %26 = arith.addf %23, %25 : vector<8x16xf32>
    %27 = tpu.iota {dimensions = array<i32: 1>} : vector<8x16xi32>
    %c10_i32 = arith.constant 10 : i32
    %28 = vector.broadcast %c10_i32 : i32 to vector<8x16xi32>
    %29 = arith.cmpi slt, %27, %28 : vector<8x16xi32>
    %cst_23 = arith.constant -1.000000e+30 : f32
    %30 = vector.broadcast %cst_23 : f32 to vector<8x16xf32>
    %31 = arith.select %29, %26, %30 : vector<8x16xi1>, vector<8x16xf32>
    %cst_24 = arith.constant dense<0xFF800000> : vector<8xf32>
    %32 = vector.multi_reduction <maximumf>, %31, %cst_24 [1] : vector<8x16xf32> to vector<8xf32>
    %33 = vector.shape_cast %32 : vector<8xf32> to vector<8x1xf32>
    %34 = vector.broadcast %33 : vector<8x1xf32> to vector<8x16xf32>
    %35 = arith.subf %31, %34 : vector<8x16xf32>
    %36 = math.exp %35 : vector<8x16xf32>
    %cst_25 = arith.constant 0.000000e+00 : f32
    %37 = vector.broadcast %cst_25 : f32 to vector<8x16xf32>
    %38 = arith.select %29, %36, %37 : vector<8x16xi1>, vector<8x16xf32>
    %cst_26 = arith.constant dense<0.000000e+00> : vector<8xf32>
    %39 = vector.multi_reduction <add>, %38, %cst_26 [1] : vector<8x16xf32> to vector<8xf32>
    %40 = vector.shape_cast %39 : vector<8xf32> to vector<8x1xf32>
    %41 = math.log %40 : vector<8x1xf32>
    %42 = vector.broadcast %41 : vector<8x1xf32> to vector<8x16xf32>
    %43 = arith.subf %35, %42 : vector<8x16xf32>
    %c0_27 = arith.constant 0 : index
    %c0_28 = arith.constant 0 : index
    %44 = vector.load %arg10[%c0_27, %c0_28] : memref<8x16xf32, #tpu.memory_space<vmem>>, vector<8x16xf32>
    tpu.vector_store %arg10[%c0_27, %c0_28], %43 {strides = array<i32>} : memref<8x16xf32, #tpu.memory_space<vmem>>, vector<8x16xf32>,
    return
  }
  func.func @transform_0(%arg0: i32) -> (i32, i32) {
    %c0_i32 = arith.constant 0 : i32
    %c0_i32_0 = arith.constant 0 : i32
    return %arg0, %c0_i32 : i32, i32
  }
  func.func @transform_1(%arg0: i32) -> (i32, i32) {
    %c0_i32 = arith.constant 0 : i32
    %c0_i32_0 = arith.constant 0 : i32
    %c0_i32_1 = arith.constant 0 : i32
    return %c0_i32, %c0_i32_0 : i32, i32
  }
  func.func @transform_2(%arg0: i32) -> (i32, i32) {
    %c0_i32 = arith.constant 0 : i32
    %c0_i32_0 = arith.constant 0 : i32
    %c0_i32_1 = arith.constant 0 : i32
    return %c0_i32, %c0_i32_0 : i32, i32
  }
  func.func @transform_3(%arg0: i32) -> (i32, i32) {
    %c0_i32 = arith.constant 0 : i32
    %c0_i32_0 = arith.constant 0 : i32
    %c0_i32_1 = arith.constant 0 : i32
    return %c0_i32, %c0_i32_0 : i32, i32
  }
  func.func @transform_4(%arg0: i32) -> (i32, i32) {
    %c0_i32 = arith.constant 0 : i32
    %c0_i32_0 = arith.constant 0 : i32
    %c0_i32_1 = arith.constant 0 : i32
    return %c0_i32, %c0_i32_0 : i32, i32
  }
  func.func @transform_5(%arg0: i32) -> (i32, i32) {
    %c0_i32 = arith.constant 0 : i32
    %c0_i32_0 = arith.constant 0 : i32
    %c0_i32_1 = arith.constant 0 : i32
    return %c0_i32, %c0_i32_0 : i32, i32
  }
  func.func @transform_6(%arg0: i32) -> (i32, i32) {
    %c0_i32 = arith.constant 0 : i32
    %c0_i32_0 = arith.constant 0 : i32
    %c0_i32_1 = arith.constant 0 : i32
    return %c0_i32, %c0_i32_0 : i32, i32
  }
  func.func @transform_7(%arg0: i32) -> (i32, i32) {
    %c0_i32 = arith.constant 0 : i32
    %c0_i32_0 = arith.constant 0 : i32
    %c0_i32_1 = arith.constant 0 : i32
    return %c0_i32, %c0_i32_0 : i32, i32
  }
  func.func @transform_8(%arg0: i32) -> (i32, i32) {
    %c0_i32 = arith.constant 0 : i32
    %c0_i32_0 = arith.constant 0 : i32
    %c0_i32_1 = arith.constant 0 : i32
    return %c0_i32, %c0_i32_0 : i32, i32
  }
  func.func @transform_9(%arg0: i32) -> (i32, i32) {
    %c0_i32 = arith.constant 0 : i32
    %c0_i32_0 = arith.constant 0 : i32
    return %arg0, %c0_i32 : i32, i32
  }
}

</mosaic_0001>

<bundles_post_ra>
// kernel: tpu_custom_call.1
= control target key start
LH: loop header
LB: loop body
LE: loop exit
PB: predicated region body
PF: predicated region fallthrough
CT: control target
= control target key end

     0   :  { %14 = vsyncpa [#allocation3], 0  ;;  %s527_s0 = inlined_call_operand.hbm [shape: f32[8,16], index: 0, kind: input, shape index: {}]   ;;  %s528_s1 = inlined_call_operand.vmem [shape: f32[16,128], index: 1, kind: input, shape index: {}]   ;;  %s529_s2 = inlined_call_operand.vmem [shape: f32[1,128], index: 2, kind: input, shape index: {}]   ;;  %s530_s3 = inlined_call_operand.vmem [shape: f32[128,128], index: 3, kind: input, shape index: {}]   ;;  %s531_s4 = inlined_call_operand.vmem [shape: f32[1,128], index: 4, kind: input, shape index: {}]   ;;  %s532_s5 = inlined_call_operand.hbm [shape: f32[128,128], index: 5, kind: input, shape index: {}]   ;;  %s533_s6 = inlined_call_operand.vmem [shape: f32[1,128], index: 6, kind: input, shape index: {}]   ;;  %s534_s7 = inlined_call_operand.vmem [shape: f32[128,16], index: 7, kind: input, shape index: {}]   ;;  %s535_s8 = inlined_call_operand.vmem [shape: f32[1,16], index: 8, kind: input, shape index: {}]   ;;  %s536_s9 = inlined_call_operand.hbm [shape: f32[8,16], index: 9, kind: output, shape index: {}]  }
   0x1   :  { %15 = vsyncpa [#allocation6], 0 }
   0x2   :  { %16 = vsyncpa [#allocation4], 0  ;;  %s22_s11 = sshll.u32 %s527_s0, 4  ;;  %s345_s12 = smov [#allocation2]   ;;  %s23_s11 = int_to_ptr.hbm [resolvable:$true] %s22_s11 }
   0x3   :  { %s24_s13 = sshll.u32 %s345_s12, 4  ;;  %s40_s16 = sshll.u32 %s532_s5, 4  ;;  %s25_s13 = int_to_ptr.vmem [resolvable:$true] %s24_s13  ;;  %s41_s16 = int_to_ptr.hbm [resolvable:$true] %s40_s16 }
   0x4   :  { %27 = dma.hbm_to_vmem [thread:$0]  %s23_s11, 128, %s25_s13, [#allocation3]  }
   0x5   :  { %s346_s17 = smov [#allocation5]   ;;  %s347_s19 = smov 128  }
   0x6   :  { %s42_s18 = sshll.u32 %s346_s17, 4  ;;  %s348_s20 = smov 8   ;;  %s43_s18 = int_to_ptr.vmem [resolvable:$true] %s42_s18 }
   0x7   :  { %48 = dma.hbm_to_vmem [thread:$0]  %s41_s16, 2048, %s43_s18, [#allocation6], %s347_s19, %s347_s19, %s348_s20  }
   0x8   :  { %339 = dma.done.wait [#allocation3], 128  }
   0x9   :  { %340 = vsyncadd [#allocation3], 4294967168 }
   0xa   :  { %341 = dma.done.wait [#allocation6], 2048  }
   0xb   :  { %342 = vsyncadd [#allocation6], 4294965248  ;;  %v65_v0 = vld [vmem:[%s528_s1 + $0x8] sm:$0xff]  ;;  %v64_v1 = vld [vmem:[%s528_s1] sm:$0xff]  ;;  %vm70_vm0 = vcmask 130048   ;;  %v217_v63 = vlaneseq  ;;  %s242_s0 = sshll.u32 %s536_s9, 4  ;;  %s243_s0 = int_to_ptr.hbm [resolvable:$true] %s242_s0 }
   0xc   :  { %88 = vmatpush.msra.mxu0 %v65_v0  ;;  %v63_v2 = vld [vmem:[#allocation2] sm:$0xff]  ;;  %v110_v3 = vld [vmem:[%s530_s3 + $0x78] sm:$0xff]  ;;  %v109_v4 = vld [vmem:[%s530_s3 + $0x70] sm:$0xff] }
   0xd   :  { %115 = vmatpush.msra.mxu1 %v110_v3  ;;  %v108_v5 = vld [vmem:[%s530_s3 + $0x68] sm:$0xff]  ;;  %v107_v6 = vld [vmem:[%s530_s3 + $0x60] sm:$0xff]  ;;  %v106_v7 = vld [vmem:[%s530_s3 + $0x58] sm:$0xff]  ;;  %v218_v0 = vand.u32 127, %v217_v63 }
   0xe   :  { %89 = vmatpush.msra.mxu0 %v64_v1  ;;  %v105_v8 = vld [vmem:[%s530_s3 + $0x50] sm:$0xff]  ;;  %v104_v9 = vld [vmem:[%s530_s3 + $0x48] sm:$0xff]  ;;  %v103_v10 = vld [vmem:[%s530_s3 + $0x40] sm:$0xff] }
   0xf   :  { %253 = vmatmul.msk.f32.vlgmr.msra.gmra.mxu0 %vm70_vm0, %v63_v2  ;;  %116 = vmatpush.msra.mxu1 %v109_v4  ;;  %v102_v11 = vld [vmem:[%s530_s3 + $0x38] sm:$0xff]  ;;  %v101_v12 = vld [vmem:[%s530_s3 + $0x30] sm:$0xff]  ;;  %v100_v13 = vld [vmem:[%s530_s3 + $0x28] sm:$0xff]  ;;  %vm219_vm1 = vcmp.lt.s32.totalorder %v218_v0, 10 }
  0x10   :  { %v99_v14 = vld [vmem:[%s530_s3 + $0x20] sm:$0xff]  ;;  %v98_v15 = vld [vmem:[%s530_s3 + $0x18] sm:$0xff]  ;;  %v97_v16 = vld [vmem:[%s530_s3 + $0x10] sm:$0xff] }
  0x11   :  { %117 = vmatpush.msra.mxu1 %v108_v5  ;;  %v96_v17 = vld [vmem:[%s530_s3 + $0x8] sm:$0xff]  ;;  %v95_v18 = vld [vmem:[%s530_s3] sm:$0xff]  ;;  %v150_v20 = vld [vmem:[#allocation5 + $0x70] sm:$0xff] }
  0x12   :  { %v151_v19 = vld [vmem:[#allocation5 + $0x78] sm:$0xff]  ;;  %v149_v21 = vld [vmem:[#allocation5 + $0x68] sm:$0xff]  ;;  %v148_v22 = vld [vmem:[#allocation5 + $0x60] sm:$0xff] }
  0x13   :  { %118 = vmatpush.msra.mxu1 %v107_v6  ;;  %156 = vmatpush.msra.mxu2 %v151_v19  ;;  %v147_v23 = vld [vmem:[#allocation5 + $0x58] sm:$0xff]  ;;  %v146_v24 = vld [vmem:[#allocation5 + $0x50] sm:$0xff]  ;;  %v145_v25 = vld [vmem:[#allocation5 + $0x48] sm:$0xff] }
  0x14   :  { %v144_v26 = vld [vmem:[#allocation5 + $0x40] sm:$0xff]  ;;  %v143_v27 = vld [vmem:[#allocation5 + $0x38] sm:$0xff]  ;;  %v142_v28 = vld [vmem:[#allocation5 + $0x30] sm:$0xff] }
  0x15   :  { %119 = vmatpush.msra.mxu1 %v106_v7  ;;  %157 = vmatpush.msra.mxu2 %v150_v20  ;;  %v141_v29 = vld [vmem:[#allocation5 + $0x28] sm:$0xff]  ;;  %v140_v30 = vld [vmem:[#allocation5 + $0x20] sm:$0xff]  ;;  %v139_v31 = vld [vmem:[#allocation5 + $0x18] sm:$0xff] }
  0x16   :  { %v259_v32 = vld [vmem:[%s529_s2] ss:$0 sm:$0xff]  ;;  %v138_v36 = vld [vmem:[#allocation5 + $0x10] sm:$0xff]  ;;  %v137_v37 = vld [vmem:[#allocation5 + $0x8] sm:$0xff] }
  0x17   :  { %120 = vmatpush.msra.mxu1 %v105_v8  ;;  %158 = vmatpush.msra.mxu2 %v149_v21  ;;  %v136_v38 = vld [vmem:[#allocation5] sm:$0xff]  ;;  %v192_v39 = vld [vmem:[%s534_s7 + $0x78] sm:$0xff]  ;;  %v191_v40 = vld [vmem:[%s534_s7 + $0x70] sm:$0xff] }
  0x18   :  { %197 = vmatpush.msra.mxu3 %v192_v39  ;;  %v190_v41 = vld [vmem:[%s534_s7 + $0x68] sm:$0xff]  ;;  %v189_v42 = vld [vmem:[%s534_s7 + $0x60] sm:$0xff]  ;;  %v188_v43 = vld [vmem:[%s534_s7 + $0x58] sm:$0xff] }
  0x19   :  { %121 = vmatpush.msra.mxu1 %v104_v9  ;;  %159 = vmatpush.msra.mxu2 %v148_v22  ;;  %v187_v44 = vld [vmem:[%s534_s7 + $0x50] sm:$0xff]  ;;  %v186_v45 = vld [vmem:[%s534_s7 + $0x48] sm:$0xff]  ;;  %v185_v46 = vld [vmem:[%s534_s7 + $0x40] sm:$0xff] }
  0x1a   :  { %198 = vmatpush.msra.mxu3 %v191_v40  ;;  %v184_v47 = vld [vmem:[%s534_s7 + $0x38] sm:$0xff]  ;;  %v183_v48 = vld [vmem:[%s534_s7 + $0x30] sm:$0xff]  ;;  %v182_v49 = vld [vmem:[%s534_s7 + $0x28] sm:$0xff] }
  0x1b   :  { %122 = vmatpush.msra.mxu1 %v103_v10  ;;  %160 = vmatpush.msra.mxu2 %v147_v23  ;;  %v181_v50 = vld [vmem:[%s534_s7 + $0x20] sm:$0xff]  ;;  %v180_v51 = vld [vmem:[%s534_s7 + $0x18] sm:$0xff]  ;;  %v179_v56 = vld [vmem:[%s534_s7 + $0x10] sm:$0xff] }
  0x1c   :  { %199 = vmatpush.msra.mxu3 %v190_v41  ;;  %v260_v52 = vld [vmem:[%s531_s4] ss:$0 sm:$0xff]  ;;  %v178_v57 = vld [vmem:[%s534_s7 + $0x8] sm:$0xff] }
  0x1d   :  { %123 = vmatpush.msra.mxu1 %v102_v11  ;;  %161 = vmatpush.msra.mxu2 %v146_v24  ;;  %v177_v58 = vld [vmem:[%s534_s7] sm:$0xff] }
  0x1e   :  { %200 = vmatpush.msra.mxu3 %v189_v42  ;;  %v261_v59 = vld [vmem:[%s533_s6] ss:$0 sm:$0xff]  ;;  %s349_s6 = smov [#allocation7]  }
  0x1f   :  { %124 = vmatpush.msra.mxu1 %v101_v12  ;;  %162 = vmatpush.msra.mxu2 %v145_v25  ;;  %v262_v1 = vld [vmem:[%s535_s8] ss:$0 sm:$0xff]  ;;  %s240_s7 = sshll.u32 %s349_s6, 4  ;;  %s241_s7 = int_to_ptr.vmem [resolvable:$true] %s240_s7 }
  0x20   :  { %201 = vmatpush.msra.mxu3 %v188_v43 }
  0x21   :  { %125 = vmatpush.msra.mxu1 %v100_v13  ;;  %163 = vmatpush.msra.mxu2 %v144_v26 }
  0x22   :  { %202 = vmatpush.msra.mxu3 %v187_v44 }
  0x23   :  { %126 = vmatpush.msra.mxu1 %v99_v14  ;;  %164 = vmatpush.msra.mxu2 %v143_v27 }
  0x24   :  { %203 = vmatpush.msra.mxu3 %v186_v45 }
  0x25   :  { %127 = vmatpush.msra.mxu1 %v98_v15  ;;  %165 = vmatpush.msra.mxu2 %v142_v28 }
  0x26   :  { %204 = vmatpush.msra.mxu3 %v185_v46 }
  0x27   :  { %128 = vmatpush.msra.mxu1 %v97_v16  ;;  %166 = vmatpush.msra.mxu2 %v141_v29 }
  0x28   :  { %205 = vmatpush.msra.mxu3 %v184_v47 }
  0x29   :  { %129 = vmatpush.msra.mxu1 %v96_v17  ;;  %167 = vmatpush.msra.mxu2 %v140_v30 }
  0x2a   :  { %206 = vmatpush.msra.mxu3 %v183_v48 }
  0x2b   :  { %130 = vmatpush.msra.mxu1 %v95_v18  ;;  %168 = vmatpush.msra.mxu2 %v139_v31 }
  0x2c   :  { %207 = vmatpush.msra.mxu3 %v182_v49 }
  0x2d   :  { %169 = vmatpush.msra.mxu2 %v138_v36 }
  0x2e   :  { %208 = vmatpush.msra.mxu3 %v181_v50 }
  0x2f   :  { %170 = vmatpush.msra.mxu2 %v137_v37 }
  0x30   :  { %209 = vmatpush.msra.mxu3 %v180_v51 }
  0x31   :  { %171 = vmatpush.msra.mxu2 %v136_v38 }
  0x32   :  { %210 = vmatpush.msra.mxu3 %v179_v56 }
  0x34   :  { %211 = vmatpush.msra.mxu3 %v178_v57 }
  0x36   :  { %212 = vmatpush.msra.mxu3 %v177_v58 }
  0x8c   :  { %v91_v33 = vpop.f32.mrf.mxu0 }
  0x8d   :  { %v92_v34 = vadd.f32 %v259_v32, %v91_v33 }
  0x8f   :  { %v94_v35 = vmax.f32 %v92_v34, 0.0 }
  0x91   :  { %131 = vmatmul.f32.vlgmr.msra.gmra.mxu1 %v94_v35 }
 0x10e   :  { %v132_v53 = vpop.f32.mrf.mxu1 }
 0x10f   :  { %v133_v54 = vadd.f32 %v260_v52, %v132_v53 }
 0x111   :  { %v135_v55 = vmax.f32 %v133_v54, 0.0 }
 0x113   :  { %172 = vmatmul.f32.vlgmr.msra.gmra.mxu2 %v135_v55 }
 0x196   :  { %v173_v60 = vpop.f32.mrf.mxu2 }
 0x197   :  { %v174_v61 = vadd.f32 %v261_v59, %v173_v60 }
 0x199   :  { %v176_v62 = vmax.f32 %v174_v61, 0.0 }
 0x19b   :  { %213 = vmatmul.f32.vlgmr.msra.gmra.mxu3 %v176_v62 }
 0x21e   :  { %v214_v2 = vpop.f32.mrf.mxu3 }
 0x21f   :  { %v215_v3 = vadd.f32 %v262_v1, %v214_v2 }
 0x221   :  { %v220_v4 = vsel %vm219_vm1, %v215_v3, -1e+30 }
 0x222   :  { %v221_v5 = vsel %vm70_vm0, %v220_v4, -inf }
 0x223   :  { %222 = vmax.xlane.f32.xlu0 %v221_v5 }
 0x296   :  { %v223_v6 = vpop.xlane.xlu0 %222 }
 0x297   :  { %v224_v7 = vsub.f32 %v220_v4, %v223_v6 }
 0x299   :  { %v225_v8 = vmul.f32 1.442695, %v224_v7 }
 0x29b   :  { %263 = vpow2.f32 %v225_v8 }
 0x2a1   :  { %v264_v9 = vpop.eup %263 }
 0x2a2   :  { %v227_v10 = vsel %vm219_vm1, %v264_v9, 0.0 }
 0x2a3   :  { %v228_v11 = vsel %vm70_vm0, %v227_v10, 0.0 }
 0x2a4   :  { %229 = vadd.xlane.f32.xlu0 %v228_v11 }
 0x317   :  { %v230_v12 = vpop.xlane.xlu0 %229 }
 0x318   :  { %265 = vlog2.f32 %v230_v12 }
 0x31e   :  { %v266_v13 = vpop.eup %265 }
 0x31f   :  { %v232_v14 = vmul.f32 0.6931472, %v266_v13 }
 0x321   :  { %v233_v15 = vsub.f32 %v224_v7, %v232_v14 }
 0x323   :  { %234 = vst.msk [vmem:[#allocation7] sm:$0xff] %vm70_vm0, %v233_v15 }
 0x324   :  { %245 = dma.vmem_to_hbm [thread:$0]  %s241_s7, 128, %s243_s0, [#allocation4]  }
 0x325   :  { %343 = dma.done.wait [#allocation4], 128  }
 0x326   :  { %344 = vsyncadd [#allocation4], 4294967168 }
 0x327   :  { %250 = vsyncpa [#allocation3], 1 }
 0x328   :  { %251 = vsyncpa [#allocation6], 1 }
 0x329   :  { %252 = vsyncpa [#allocation4], 1 }

</bundles_post_ra>
